<compile_context>
chip_gen: v5e
topology: v5e:2x2
jax: 0.10.0
libtpu: 0.0.40
codegen_flags: <defaults>
</compile_context>

<pallas_src>
import jax
import jax.numpy as jnp
from jax.experimental import pallas as pl
from jax.experimental.pallas import tpu as pltpu


def _round_up(x, m):
    return ((x + m - 1) // m) * m


# --------------------------------------------------------------------------
# Kernel: one batch tile of the fused policy+value forward pass.
# --------------------------------------------------------------------------
def _fused_fc_kernel(obs_ref, w1_ref, w2_ref, wh_ref, b_ref, out_ref):
    """Inputs (all f32):
         obs_ref : [TILE_B, D]   batch tile of flat observations
         w1_ref  : [D, P]        [w1 || vw1], zero padded to P lanes
         w2_ref  : [P, P]        blockdiag(w2, vw2), zero padded
         wh_ref  : [P, P]        rows 0:H -> logits cols, rows H:2H -> value col
         b_ref   : [3, P]        packed biases for the three fused layers
       Output:
         out_ref : [TILE_B, P]   cols 0:num_outputs = logits,
                                 col num_outputs    = value, rest zero pad.
    """
    hp = jax.lax.Precision.HIGHEST
    x = obs_ref[...]

    h = jnp.tanh(
        jnp.dot(x, w1_ref[...], preferred_element_type=jnp.float32, precision=hp)
        + b_ref[0:1, :]
    )
    h = jnp.tanh(
        jnp.dot(h, w2_ref[...], preferred_element_type=jnp.float32, precision=hp)
        + b_ref[1:2, :]
    )
    out_ref[...] = (
        jnp.dot(h, wh_ref[...], preferred_element_type=jnp.float32, precision=hp)
        + b_ref[2:3, :]
    )


# --------------------------------------------------------------------------
# Parameter packing: fuse the 12 per-layer TorchFC tensors into 4 lane-dense
# arrays (done once, outside the kernel).
# --------------------------------------------------------------------------
def pack_params(p, obs_dim, hidden, num_outputs):
    H = hidden
    P = _round_up(max(2 * H, num_outputs + 1), 128)

    w1 = jnp.zeros((obs_dim, P), jnp.float32)
    w1 = w1.at[:, :H].set(p["w1"]).at[:, H:2 * H].set(p["vw1"])

    w2 = jnp.zeros((P, P), jnp.float32)
    w2 = w2.at[:H, :H].set(p["w2"]).at[H:2 * H, H:2 * H].set(p["vw2"])

    wh = jnp.zeros((P, P), jnp.float32)
    wh = wh.at[:H, :num_outputs].set(p["wl"])
    wh = wh.at[H:2 * H, num_outputs:num_outputs + 1].set(p["vw3"])

    b = jnp.zeros((3, P), jnp.float32)
    b = b.at[0, :H].set(p["b1"][0]).at[0, H:2 * H].set(p["vb1"][0])
    b = b.at[1, :H].set(p["b2"][0]).at[1, H:2 * H].set(p["vb2"][0])
    b = b.at[2, :num_outputs].set(p["bl"][0]).at[2, num_outputs].set(p["vb3"][0, 0])

    return {"w1": w1, "w2": w2, "wh": wh, "b": b}


# --------------------------------------------------------------------------
# Wrapper: batch-tiled pallas_call; returns (logits [B, num_outputs], value [B]).
# --------------------------------------------------------------------------
def torch_model_forward(obs, packed, num_outputs, *, tile_b=None):
    B, D = obs.shape
    P = packed["w1"].shape[1]

    if tile_b is None:
        # Big batch tiles amortize the per-step pipeline overhead; small
        # batches just round up to the 8-sublane minimum.
        tile_b = 256 if B >= 256 else _round_up(max(B, 1), 8)
    tile_b = max(8, min(tile_b, _round_up(B, 8)))

    B_pad = _round_up(B, tile_b)
    if B_pad != B:
        obs = jnp.pad(obs, ((0, B_pad - B), (0, 0)))

    grid = (B_pad // tile_b,)

    out = pl.pallas_call(
        _fused_fc_kernel,
        out_shape=jax.ShapeDtypeStruct((B_pad, P), jnp.float32),
        grid_spec=pltpu.PrefetchScalarGridSpec(
            num_scalar_prefetch=0,
            grid=grid,
            in_specs=[
                pl.BlockSpec((tile_b, D), lambda i: (i, 0)),  # obs: tiled on batch
                pl.BlockSpec((D, P), lambda i: (0, 0)),       # fused W1: resident
                pl.BlockSpec((P, P), lambda i: (0, 0)),       # fused W2: resident
                pl.BlockSpec((P, P), lambda i: (0, 0)),       # fused head: resident
                pl.BlockSpec((3, P), lambda i: (0, 0)),       # packed biases
            ],
            out_specs=pl.BlockSpec((tile_b, P), lambda i: (i, 0)),
        ),
        compiler_params=pltpu.CompilerParams(
            dimension_semantics=("parallel",),
        ),
    )(obs, packed["w1"], packed["w2"], packed["wh"], packed["b"])

    logits = out[:B, :num_outputs]
    value = out[:B, num_outputs]          # value_function() squeezes to [B]
    return logits, value


# --------------------------------------------------------------------------
# Deterministic (seeded) per-layer parameter init matching TorchFC shapes.
# Linear weights are stored as [in_dim, out_dim] (y = x @ W + b).
# --------------------------------------------------------------------------
def init_params(key, obs_dim, hidden, num_outputs):
    ks = jax.random.split(key, 6)
    scale = 0.1

    def w(k, shape):
        return scale * jax.random.normal(k, shape, dtype=jnp.float32)

    return {
        # policy trunk
        "w1": w(ks[0], (obs_dim, hidden)),
        "b1": jnp.zeros((1, hidden), jnp.float32),
        "w2": w(ks[1], (hidden, hidden)),
        "b2": jnp.zeros((1, hidden), jnp.float32),
        "wl": w(ks[2], (hidden, num_outputs)),
        "bl": jnp.zeros((1, num_outputs), jnp.float32),
        # separate value branch (vf_share_layers=False)
        "vw1": w(ks[3], (obs_dim, hidden)),
        "vb1": jnp.zeros((1, hidden), jnp.float32),
        "vw2": w(ks[4], (hidden, hidden)),
        "vb2": jnp.zeros((1, hidden), jnp.float32),
        "vw3": w(ks[5], (hidden, 1)),
        "vb3": jnp.zeros((1, 1), jnp.float32),
    }


def _reference_forward(obs, p):
    """Pure-JAX reference of the same math (unfused), for correctness check."""
    hp = jax.lax.Precision.HIGHEST
    h = jnp.tanh(jnp.dot(obs, p["w1"], precision=hp) + p["b1"])
    h = jnp.tanh(jnp.dot(h, p["w2"], precision=hp) + p["b2"])
    logits = jnp.dot(h, p["wl"], precision=hp) + p["bl"]
    v = jnp.tanh(jnp.dot(obs, p["vw1"], precision=hp) + p["vb1"])
    v = jnp.tanh(jnp.dot(v, p["vw2"], precision=hp) + p["vb2"])
    value = (jnp.dot(v, p["vw3"], precision=hp) + p["vb3"])[:, 0]
    return logits, value


if __name__ == "__main__":
    # Small shapes consistent with a flat-obs RLlib policy model.
    batch = 8
    obs_dim = 32          # flattened observation size
    hidden = 32           # fcnet_hiddens = [32, 32]
    num_outputs = 8       # action logits

    key = jax.random.PRNGKey(0)
    k_obs, k_par = jax.random.split(key)
    obs = jax.random.normal(k_obs, (batch, obs_dim), dtype=jnp.float32)
    params = init_params(k_par, obs_dim, hidden, num_outputs)
    packed = pack_params(params, obs_dim, hidden, num_outputs)

    logits, value = torch_model_forward(obs, packed, num_outputs)
    logits = jax.block_until_ready(logits)
    value = jax.block_until_ready(value)

    ref_logits, ref_value = _reference_forward(obs, params)
    assert logits.shape == (batch, num_outputs)
    assert value.shape == (batch,)
    assert jnp.allclose(logits, ref_logits, atol=1e-5, rtol=1e-5)
    assert jnp.allclose(value, ref_value, atol=1e-5, rtol=1e-5)

    print("KERNEL_OK")
</pallas_src>

<mosaic_0001>
module attributes {stable_mosaic.version = 11 : i64} {
  func.func @_fused_fc_kernel(%arg0: i32, %arg1: memref<8x32xf32, #tpu.memory_space<vmem>>, %arg2: memref<32x128xf32, #tpu.memory_space<vmem>>, %arg3: memref<128x128xf32, #tpu.memory_space<vmem>>, %arg4: memref<128x128xf32, #tpu.memory_space<vmem>>, %arg5: memref<3x128xf32, #tpu.memory_space<vmem>>, %arg6: memref<8x128xf32, #tpu.memory_space<vmem>>) attributes {dimension_semantics = [#tpu.dimension_semantics<parallel>], iteration_bounds = array<i64: 1>, scalar_prefetch = 0 : i64, scratch_operands = 0 : i64, tpu.core_type = #tpu.core_type<tc>, window_params = [{transform_indices = @transform_0, window_bounds = array<i64: 8, 32>}, {pipeline_mode = #tpu.pipeline_mode<synchronous>, transform_indices = @transform_1, window_bounds = array<i64: 32, 128>}, {pipeline_mode = #tpu.pipeline_mode<synchronous>, transform_indices = @transform_2, window_bounds = array<i64: 128, 128>}, {pipeline_mode = #tpu.pipeline_mode<synchronous>, transform_indices = @transform_3, window_bounds = array<i64: 128, 128>}, {pipeline_mode = #tpu.pipeline_mode<synchronous>, transform_indices = @transform_4, window_bounds = array<i64: 3, 128>}, {transform_indices = @transform_5, window_bounds = array<i64: 8, 128>}]} {
    %c0 = arith.constant 0 : index
    %c0_0 = arith.constant 0 : index
    %0 = vector.load %arg1[%c0, %c0_0] : memref<8x32xf32, #tpu.memory_space<vmem>>, vector<8x32xf32>
    %c0_1 = arith.constant 0 : index
    %c0_2 = arith.constant 0 : index
    %1 = vector.load %arg2[%c0_1, %c0_2] : memref<32x128xf32, #tpu.memory_space<vmem>>, vector<32x128xf32>
    %cst = arith.constant dense<0.000000e+00> : vector<8x128xf32>
    %2 = tpu.matmul %0, %1, %cst {dimension_numbers = #tpu.dot_dimension_numbers<[1], [0], [0], [1], [0, 0, 1, 1], [], []>, precision = #tpu.contract_precision<fp32>} : vector<8x32xf32>, vector<32x128xf32>, vector<8x128xf32> -> vector<8x128xf32>
    %c0_3 = arith.constant 0 : index
    %c0_4 = arith.constant 0 : index
    %3 = vector.load %arg5[%c0_3, %c0_4] : memref<3x128xf32, #tpu.memory_space<vmem>>, vector<1x128xf32>
    %4 = vector.broadcast %3 : vector<1x128xf32> to vector<8x128xf32>
    %5 = arith.addf %2, %4 : vector<8x128xf32>
    %6 = math.tanh %5 : vector<8x128xf32>
    %c0_5 = arith.constant 0 : index
    %c0_6 = arith.constant 0 : index
    %7 = vector.load %arg3[%c0_5, %c0_6] : memref<128x128xf32, #tpu.memory_space<vmem>>, vector<128x128xf32>
    %cst_7 = arith.constant dense<0.000000e+00> : vector<8x128xf32>
    %8 = tpu.matmul %6, %7, %cst_7 {dimension_numbers = #tpu.dot_dimension_numbers<[1], [0], [0], [1], [0, 0, 1, 1], [], []>, precision = #tpu.contract_precision<fp32>} : vector<8x128xf32>, vector<128x128xf32>, vector<8x128xf32> -> vector<8x128xf32>
    %c1 = arith.constant 1 : index
    %c0_8 = arith.constant 0 : index
    %9 = vector.load %arg5[%c1, %c0_8] : memref<3x128xf32, #tpu.memory_space<vmem>>, vector<1x128xf32>
    %10 = vector.broadcast %9 : vector<1x128xf32> to vector<8x128xf32>
    %11 = arith.addf %8, %10 : vector<8x128xf32>
    %12 = math.tanh %11 : vector<8x128xf32>
    %c0_9 = arith.constant 0 : index
    %c0_10 = arith.constant 0 : index
    %13 = vector.load %arg4[%c0_9, %c0_10] : memref<128x128xf32, #tpu.memory_space<vmem>>, vector<128x128xf32>
    %cst_11 = arith.constant dense<0.000000e+00> : vector<8x128xf32>
    %14 = tpu.matmul %12, %13, %cst_11 {dimension_numbers = #tpu.dot_dimension_numbers<[1], [0], [0], [1], [0, 0, 1, 1], [], []>, precision = #tpu.contract_precision<fp32>} : vector<8x128xf32>, vector<128x128xf32>, vector<8x128xf32> -> vector<8x128xf32>
    %c2 = arith.constant 2 : index
    %c0_12 = arith.constant 0 : index
    %15 = vector.load %arg5[%c2, %c0_12] : memref<3x128xf32, #tpu.memory_space<vmem>>, vector<1x128xf32>
    %16 = vector.broadcast %15 : vector<1x128xf32> to vector<8x128xf32>
    %17 = arith.addf %14, %16 : vector<8x128xf32>
    %c0_13 = arith.constant 0 : index
    %c0_14 = arith.constant 0 : index
    %18 = vector.load %arg6[%c0_13, %c0_14] : memref<8x128xf32, #tpu.memory_space<vmem>>, vector<8x128xf32>
    tpu.vector_store %arg6[%c0_13, %c0_14], %17 {strides = array<i32>} : memref<8x128xf32, #tpu.memory_space<vmem>>, vector<8x128xf32>,
    return
  }
  func.func @transform_0(%arg0: i32) -> (i32, i32) {
    %c0_i32 = arith.constant 0 : i32
    %c0_i32_0 = arith.constant 0 : i32
    return %arg0, %c0_i32 : i32, i32
  }
  func.func @transform_1(%arg0: i32) -> (i32, i32) {
    %c0_i32 = arith.constant 0 : i32
    %c0_i32_0 = arith.constant 0 : i32
    %c0_i32_1 = arith.constant 0 : i32
    return %c0_i32, %c0_i32_0 : i32, i32
  }
  func.func @transform_2(%arg0: i32) -> (i32, i32) {
    %c0_i32 = arith.constant 0 : i32
    %c0_i32_0 = arith.constant 0 : i32
    %c0_i32_1 = arith.constant 0 : i32
    return %c0_i32, %c0_i32_0 : i32, i32
  }
  func.func @transform_3(%arg0: i32) -> (i32, i32) {
    %c0_i32 = arith.constant 0 : i32
    %c0_i32_0 = arith.constant 0 : i32
    %c0_i32_1 = arith.constant 0 : i32
    return %c0_i32, %c0_i32_0 : i32, i32
  }
  func.func @transform_4(%arg0: i32) -> (i32, i32) {
    %c0_i32 = arith.constant 0 : i32
    %c0_i32_0 = arith.constant 0 : i32
    %c0_i32_1 = arith.constant 0 : i32
    return %c0_i32, %c0_i32_0 : i32, i32
  }
  func.func @transform_5(%arg0: i32) -> (i32, i32) {
    %c0_i32 = arith.constant 0 : i32
    %c0_i32_0 = arith.constant 0 : i32
    return %arg0, %c0_i32 : i32, i32
  }
}

</mosaic_0001>

<bundles_post_ra>
// kernel: tpu_custom_call.1
= control target key start
LH: loop header
LB: loop body
LE: loop exit
PB: predicated region body
PF: predicated region fallthrough
CT: control target
= control target key end

     0   :  { %10 = vsyncpa [#allocation3], 0  ;;  %s1740_s0 = inlined_call_operand.hbm [shape: f32[8,32], index: 0, kind: input, shape index: {}]   ;;  %s1741_s1 = inlined_call_operand.hbm [shape: f32[32,128], index: 1, kind: input, shape index: {}]   ;;  %s1742_s2 = inlined_call_operand.hbm [shape: f32[128,128], index: 2, kind: input, shape index: {}]   ;;  %s1743_s3 = inlined_call_operand.hbm [shape: f32[128,128], index: 3, kind: input, shape index: {}]   ;;  %s1744_s4 = inlined_call_operand.hbm [shape: f32[3,128], index: 4, kind: input, shape index: {}]   ;;  %s1745_s5 = inlined_call_operand.hbm [shape: f32[8,128], index: 5, kind: output, shape index: {}]  }
   0x1   :  { %11 = vsyncpa [#allocation6], 0 }
   0x2   :  { %12 = vsyncpa [#allocation9], 0  ;;  %s29_s20 = sshll.u32 %s1741_s1, 4  ;;  %s30_s20 = int_to_ptr.hbm [resolvable:$true] %s29_s20 }
   0x3   :  { %13 = vsyncpa [#allocation4], 0  ;;  %s1198_s21 = smov [#allocation5]   ;;  %s55_s25 = sshll.u32 %s1743_s3, 4  ;;  %s56_s25 = int_to_ptr.hbm [resolvable:$true] %s55_s25 }
   0x4   :  { %s31_s22 = sshll.u32 %s1198_s21, 4  ;;  %s1199_s26 = smov 128   ;;  %s32_s22 = int_to_ptr.vmem [resolvable:$true] %s31_s22 }
   0x5   :  { %s1200_s27 = smov 8   ;;  %s1201_s28 = smov [#allocation8]  }
   0x6   :  { %37 = dma.hbm_to_vmem [thread:$0]  %s30_s20, 512, %s32_s22, [#allocation6], %s1199_s26, %s1199_s26, %s1200_s27  }
   0x7   :  { %s57_s29 = sshll.u32 %s1201_s28, 4  ;;  %s19_s7 = sshll.u32 %s1740_s0, 4  ;;  %s58_s29 = int_to_ptr.vmem [resolvable:$true] %s57_s29  ;;  %s20_s7 = int_to_ptr.hbm [resolvable:$true] %s19_s7 }
   0x8   :  { %63 = dma.hbm_to_vmem [thread:$0]  %s56_s25, 2048, %s58_s29, [#allocation9], %s1199_s26, %s1199_s26, %s1200_s27  }
   0x9   :  { %s42_s9 = sshll.u32 %s1742_s2, 4  ;;  %s1202_s10 = smov [#allocation2]   ;;  %s43_s9 = int_to_ptr.hbm [resolvable:$true] %s42_s9 }
   0xa   :  { %s21_s11 = sshll.u32 %s1202_s10, 4  ;;  %s1203_s3 = smov [#allocation7]   ;;  %s22_s11 = int_to_ptr.vmem [resolvable:$true] %s21_s11 }
   0xb   :  { %24 = dma.hbm_to_vmem [thread:$0]  %s20_s7, 128, %s22_s11, [#allocation3]  }
   0xc   :  { %s44_s12 = sshll.u32 %s1203_s3, 4  ;;  %s69_s15 = sshll.u32 %s1744_s4, 4  ;;  %s45_s12 = int_to_ptr.vmem [resolvable:$true] %s44_s12  ;;  %s70_s15 = int_to_ptr.hbm [resolvable:$true] %s69_s15 }
   0xd   :  { %50 = dma.hbm_to_vmem [thread:$0]  %s43_s9, 2048, %s45_s12, [#allocation6], %s1199_s26, %s1199_s26, %s1200_s27  }
   0xe   :  { %s1204_s0 = smov [#allocation10]  }
   0xf   :  { %s71_s16 = sshll.u32 %s1204_s0, 4  ;;  %s72_s16 = int_to_ptr.vmem [resolvable:$true] %s71_s16 }
  0x10   :  { %74 = dma.hbm_to_vmem [thread:$0]  %s70_s15, 64, %s72_s16, [#allocation9]  }
  0x11   :  { %1190 = dma.done.wait [#allocation3], 128  }
  0x12   :  { %1191 = vsyncadd [#allocation3], 4294967168 }
  0x13   :  { %1192 = dma.done.wait [#allocation6], 2560  }
  0x14   :  { %1193 = vsyncadd [#allocation6], 4294964736 }
  0x15   :  { %1194 = dma.done.wait [#allocation9], 2112  }
  0x16   :  { %1195 = vsyncadd [#allocation9], 4294965184  ;;  %vm102_vm0 = vcmask 261120   ;;  %v99_v0 = vld [vmem:[#allocation5 + $0x18] sm:$0xff]  ;;  %v98_v1 = vld [vmem:[#allocation5 + $0x10] sm:$0xff]  ;;  %s1205_s2 = smov [#allocation11]  }
  0x17   :  { %v97_v2 = vld [vmem:[#allocation5 + $0x8] sm:$0xff]  ;;  %v1251_v3 = vand.u32 4294901760, %v99_v0  ;;  %v1253_v4 = vand.u32 4294901760, %v98_v1  ;;  %v96_v6 = vld [vmem:[#allocation5] sm:$0xff]  ;;  %v95_v7 = vld [vmem:[#allocation2] sm:$0xff]  ;;  %s1017_s4 = sshll.u32 %s1205_s2, 4  ;;  %s1018_s4 = int_to_ptr.vmem [resolvable:$true] %s1017_s4 }
  0x18   :  { %v1255_v5 = vand.u32 4294901760, %v97_v2  ;;  %v307_v8 = vld [vmem:[#allocation7 + $0x78] sm:$0xff]  ;;  %v1257_v9 = vand.u32 4294901760, %v96_v6  ;;  %v104_v10 = vsel %vm102_vm0, %v95_v7, 0  ;;  %v306_v12 = vld [vmem:[#allocation7 + $0x70] sm:$0xff]  ;;  %v305_v13 = vld [vmem:[#allocation7 + $0x68] sm:$0xff] }
  0x19   :  { %v1259_v11 = vand.u32 4294901760, %v307_v8  ;;  %v148_v14 = vsub.f32 %v99_v0, %v1251_v3  ;;  %119 = vmatpush.msra.mxu0 %v1251_v3  ;;  %v1264_v15 = vsub.f32 %v98_v1, %v1253_v4  ;;  %219 = vmatpush.msra.mxu3 %v1251_v3  ;;  %v1270_v17 = vand.u32 4294901760, %v104_v10  ;;  %v304_v38 = vld [vmem:[#allocation7 + $0x60] sm:$0xff]  ;;  %v303_v39 = vld [vmem:[#allocation7 + $0x58] sm:$0xff]  ;;  %v302_v40 = vld [vmem:[#allocation7 + $0x50] sm:$0xff]  ;;  %s1019_s19 = sshll.u32 %s1745_s5, 4  ;;  %s1020_s19 = int_to_ptr.hbm [resolvable:$true] %s1019_s19 }
  0x1a   :  { %v1268_v16 = vsub.f32 %v97_v2, %v1255_v5  ;;  %v1273_v18 = vsub.f32 %v96_v6, %v1257_v9  ;;  %v1278_v20 = vand.u32 4294901760, %v306_v12  ;;  %v1280_v21 = vand.u32 4294901760, %v305_v13  ;;  %v301_v44 = vld [vmem:[#allocation7 + $0x48] sm:$0xff]  ;;  %v300_v45 = vld [vmem:[#allocation7 + $0x40] sm:$0xff]  ;;  %v299_v50 = vld [vmem:[#allocation7 + $0x38] sm:$0xff] }
  0x1b   :  { %v1276_v19 = vsub.f32 %v307_v8, %v1259_v11  ;;  %190 = vmatpush.msra.mxu2 %v148_v14  ;;  %121 = vmatpush.msra.mxu0 %v1253_v4  ;;  %v149_v22 = vand.u32 4294901760, %v148_v14  ;;  %v155_v23 = vand.u32 4294901760, %v1264_v15  ;;  %v127_v24 = vsub.f32 %v104_v10, %v1270_v17  ;;  %v298_v55 = vld [vmem:[#allocation7 + $0x30] sm:$0xff]  ;;  %v297_v60 = vld [vmem:[#allocation7 + $0x28] sm:$0xff] }
  0x1c   :  { %v161_v25 = vand.u32 4294901760, %v1268_v16  ;;  %221 = vmatpush.msra.mxu3 %v1253_v4  ;;  %v167_v26 = vand.u32 4294901760, %v1273_v18  ;;  %v1290_v28 = vsub.f32 %v306_v12, %v1278_v20  ;;  %v1293_v29 = vsub.f32 %v305_v13, %v1280_v21 }
  0x1d   :  { %v353_v27 = vand.u32 4294901760, %v1276_v19  ;;  %193 = vmatpush.msra.mxu2 %v1264_v15  ;;  %v150_v30 = vsub.f32 %v148_v14, %v149_v22  ;;  %123 = vmatpush.msra.mxu0 %v1255_v5  ;;  %v156_v31 = vsub.f32 %v1264_v15, %v155_v23  ;;  %v128_v33 = vand.u32 4294901760, %v127_v24 }
  0x1e   :  { %v162_v32 = vsub.f32 %v1268_v16, %v161_v25  ;;  %223 = vmatpush.msra.mxu3 %v1255_v5  ;;  %v168_v34 = vsub.f32 %v1273_v18, %v167_v26  ;;  %v359_v36 = vand.u32 4294901760, %v1290_v28  ;;  %v365_v37 = vand.u32 4294901760, %v1293_v29 }
  0x1f   :  { %v354_v35 = vsub.f32 %v1276_v19, %v353_v27  ;;  %v151_v41 = vand.u32 4294901760, %v150_v30  ;;  %196 = vmatpush.msra.mxu2 %v1268_v16  ;;  %v157_v42 = vand.u32 4294901760, %v156_v31  ;;  %125 = vmatpush.msra.mxu0 %v1257_v9  ;;  %v129_v43 = vsub.f32 %v127_v24, %v128_v33  ;;  %v296_v30 = vld [vmem:[#allocation7 + $0x20] sm:$0xff]  ;;  %v295_v31 = vld [vmem:[#allocation7 + $0x18] sm:$0xff] }
  0x20   :  { %v163_v46 = vand.u32 4294901760, %v162_v32  ;;  %225 = vmatpush.msra.mxu3 %v1257_v9  ;;  %v360_v48 = vsub.f32 %v1290_v28, %v359_v36  ;;  %v366_v49 = vsub.f32 %v1293_v29, %v365_v37  ;;  %v1320_v52 = vand.u32 4294901760, %v304_v38 }
  0x21   :  { %248 = vmatpush.msrb.mxu0 %v149_v22  ;;  %v355_v47 = vand.u32 4294901760, %v354_v35  ;;  %152 = vmatpush.msra.mxu1 %v151_v41  ;;  %v130_v51 = vand.u32 4294901760, %v129_v43  ;;  %v1322_v53 = vand.u32 4294901760, %v303_v39  ;;  %v1324_v54 = vand.u32 4294901760, %v302_v40 }
  0x22   :  { %199 = vmatpush.msra.mxu2 %v1273_v18  ;;  %229 = vmatmul.f32.vlgmr.msra.gmra.mxu3 %v128_v33  ;;  %v169_v56 = vand.u32 4294901760, %v168_v34  ;;  %v361_v57 = vand.u32 4294901760, %v360_v48  ;;  %v1326_v58 = vand.u32 4294901760, %v301_v44  ;;  %v1328_v59 = vand.u32 4294901760, %v300_v45  ;;  %v294_v34 = vld [vmem:[#allocation7 + $0x10] sm:$0xff] }
  0x23   :  { %202 = vmatmul.f32.vlgmr.msra.gmra.mxu2 %v127_v24  ;;  %158 = vmatpush.msra.mxu1 %v157_v42  ;;  %v1331_v61 = vsub.f32 %v304_v38, %v1320_v52  ;;  %v1334_v62 = vsub.f32 %v303_v39, %v1322_v53  ;;  %v1337_v63 = vsub.f32 %v302_v40, %v1324_v54  ;;  %v1339_v0 = vand.u32 4294901760, %v299_v50  ;;  %v293_v40 = vld [vmem:[#allocation7 + $0x8] sm:$0xff] }
  0x24   :  { %131 = vmatmul.f32.vlgmr.msra.gmra.mxu0 %v130_v51  ;;  %356 = vmatpush.msrb.mxu3 %v355_v47  ;;  %v367_v1 = vand.u32 4294901760, %v366_v49  ;;  %v1342_v2 = vsub.f32 %v301_v44, %v1326_v58  ;;  %v1345_v6 = vsub.f32 %v300_v45, %v1328_v59  ;;  %v1347_v7 = vand.u32 4294901760, %v298_v55  ;;  %v292_v45 = vld [vmem:[#allocation7] sm:$0xff] }
  0x25   :  { %252 = vmatpush.msrb.mxu0 %v155_v23  ;;  %164 = vmatpush.msra.mxu1 %v163_v46  ;;  %v371_v8 = vand.u32 4294901760, %v1331_v61  ;;  %v377_v10 = vand.u32 4294901760, %v1334_v62  ;;  %v383_v12 = vand.u32 4294901760, %v1337_v63  ;;  %v1353_v13 = vand.u32 4294901760, %v297_v60 }
  0x26   :  { %311 = vmatpush.msrb.mxu2 %v1259_v11  ;;  %362 = vmatpush.msrb.mxu3 %v361_v57  ;;  %v389_v14 = vand.u32 4294901760, %v1342_v2  ;;  %v1359_v15 = vsub.f32 %v299_v50, %v1339_v0  ;;  %v395_v16 = vand.u32 4294901760, %v1345_v6  ;;  %v1393_v38 = vand.u32 4294901760, %v296_v30 }
  0x27   :  { %256 = vmatpush.msrb.mxu0 %v161_v25  ;;  %170 = vmatpush.msra.mxu1 %v169_v56  ;;  %v372_v22 = vsub.f32 %v1331_v61, %v371_v8  ;;  %v378_v23 = vsub.f32 %v1334_v62, %v377_v10  ;;  %v384_v24 = vsub.f32 %v1337_v63, %v383_v12  ;;  %v1395_v39 = vand.u32 4294901760, %v295_v31 }
  0x28   :  { %313 = vmatpush.msrb.mxu2 %v1278_v20  ;;  %172 = vmatmul.f32.vlgmr.msra.gmra.mxu1 %v1270_v17  ;;  %v1376_v25 = vsub.f32 %v298_v55, %v1347_v7  ;;  %v1380_v33 = vsub.f32 %v297_v60, %v1353_v13  ;;  %v390_v18 = vsub.f32 %v1342_v2, %v389_v14  ;;  %v1399_v43 = vand.u32 4294901760, %v294_v34 }
  0x29   :  { %260 = vmatpush.msrb.mxu0 %v167_v26  ;;  %279 = vmatpush.msrb.mxu1 %v1251_v3  ;;  %v373_v32 = vand.u32 4294901760, %v372_v22  ;;  %v379_v35 = vand.u32 4294901760, %v378_v23  ;;  %v401_v26 = vand.u32 4294901760, %v1359_v15  ;;  %v396_v3 = vsub.f32 %v1345_v6, %v395_v16 }
  0x2a   :  { %368 = vmatpush.msrb.mxu3 %v367_v1  ;;  %315 = vmatpush.msrb.mxu2 %v1280_v21  ;;  %v385_v41 = vand.u32 4294901760, %v384_v24  ;;  %v407_v42 = vand.u32 4294901760, %v1376_v25  ;;  %v1404_v44 = vsub.f32 %v296_v30, %v1393_v38  ;;  %v391_v46 = vand.u32 4294901760, %v390_v18 }
  0x2b   :  { %454 = vmatpush.msra.mxu0 %v1276_v19  ;;  %281 = vmatpush.msrb.mxu1 %v1253_v4  ;;  %v413_v4 = vand.u32 4294901760, %v1380_v33  ;;  %v402_v47 = vsub.f32 %v1359_v15, %v401_v26  ;;  %v1412_v48 = vsub.f32 %v295_v31, %v1395_v39  ;;  %v397_v49 = vand.u32 4294901760, %v396_v3 }
  0x2c   :  { %262 = vmatmul.f32.vlgmr.msrb.gmra.mxu0 %v1270_v17  ;;  %374 = vmatpush.msrb.mxu3 %v373_v32  ;;  %v408_v50 = vsub.f32 %v1376_v25, %v407_v42  ;;  %v419_v51 = vand.u32 4294901760, %v1404_v44  ;;  %v1424_v55 = vsub.f32 %v294_v34, %v1399_v43  ;;  %v1426_v56 = vand.u32 4294901760, %v292_v45 }
  0x2d   :  { %317 = vmatpush.msrb.mxu2 %v1320_v52  ;;  %283 = vmatpush.msrb.mxu1 %v1255_v5  ;;  %v1414_v5 = vand.u32 4294901760, %v293_v40  ;;  %v425_v57 = vand.u32 4294901760, %v1412_v48 }
  0x2e   :  { %457 = vmatpush.msra.mxu0 %v1290_v28  ;;  %380 = vmatpush.msrb.mxu3 %v379_v35  ;;  %v409_v1 = vand.u32 4294901760, %v408_v50  ;;  %v420_v22 = vsub.f32 %v1404_v44, %v419_v51  ;;  %v431_v23 = vand.u32 4294901760, %v1424_v55  ;;  %v1445_v24 = vsub.f32 %v292_v45, %v1426_v56 }
  0x2f   :  { %319 = vmatpush.msrb.mxu2 %v1322_v53  ;;  %285 = vmatpush.msrb.mxu1 %v1257_v9  ;;  %v403_v9 = vand.u32 4294901760, %v402_v47  ;;  %v1435_v60 = vsub.f32 %v293_v40, %v1414_v5  ;;  %v426_v31 = vsub.f32 %v1412_v48, %v425_v57 }
  0x30   :  { %460 = vmatpush.msra.mxu0 %v1293_v29  ;;  %287 = vmatmul.f32.vlgmr.msrb.gmra.mxu1 %v1270_v17  ;;  %v414_v17 = vsub.f32 %v1380_v33, %v413_v4  ;;  %v421_v34 = vand.u32 4294901760, %v420_v22  ;;  %v432_v35 = vsub.f32 %v1424_v55, %v431_v23  ;;  %v443_v18 = vand.u32 4294901760, %v1445_v24 }
  0x31   :  { %386 = vmatpush.msrb.mxu3 %v385_v41  ;;  %321 = vmatpush.msrb.mxu2 %v1324_v54  ;;  %v437_v32 = vand.u32 4294901760, %v1435_v60  ;;  %v427_v3 = vand.u32 4294901760, %v426_v31 }
  0x32   :  { %507 = vmatpush.msra.mxu1 %v1259_v11  ;;  %463 = vmatpush.msra.mxu0 %v1331_v61  ;;  %v415_v30 = vand.u32 4294901760, %v414_v17  ;;  %v433_v41 = vand.u32 4294901760, %v432_v35  ;;  %v444_v45 = vsub.f32 %v1445_v24, %v443_v18  ;;  %v658_v17 = vld [vmem:[#allocation8 + $0x30] sm:$0xff] }
  0x33   :  { %392 = vmatpush.msrb.mxu3 %v391_v46  ;;  %323 = vmatpush.msrb.mxu2 %v1326_v58  ;;  %v438_v40 = vsub.f32 %v1435_v60, %v437_v32 }
  0x34   :  { %509 = vmatpush.msra.mxu1 %v1278_v20  ;;  %466 = vmatpush.msra.mxu0 %v1334_v62  ;;  %v445_v47 = vand.u32 4294901760, %v444_v45 }
  0x35   :  { %398 = vmatpush.msrb.mxu3 %v397_v49  ;;  %325 = vmatpush.msrb.mxu2 %v1328_v59  ;;  %v439_v46 = vand.u32 4294901760, %v438_v40  ;;  %v660_v49 = vld [vmem:[#allocation8 + $0x40] sm:$0xff] }
  0x36   :  { %511 = vmatpush.msra.mxu1 %v1280_v21  ;;  %469 = vmatpush.msra.mxu0 %v1337_v63  ;;  %v664_v63 = vld [vmem:[#allocation8 + $0x60] sm:$0xff]  ;;  %v1601_v22 = vand.u32 4294901760, %v660_v49 }
  0x37   :  { %404 = vmatpush.msrb.mxu3 %v403_v9  ;;  %327 = vmatpush.msrb.mxu2 %v1339_v0  ;;  %v659_v9 = vld [vmem:[#allocation8 + $0x38] sm:$0xff] }
  0x38   :  { %513 = vmatpush.msra.mxu1 %v1320_v52  ;;  %472 = vmatpush.msra.mxu0 %v1342_v2  ;;  %v662_v2 = vld [vmem:[#allocation8 + $0x50] sm:$0xff]  ;;  %v1608_v31 = vsub.f32 %v660_v49, %v1601_v22  ;;  %v655_v49 = vld [vmem:[#allocation8 + $0x18] sm:$0xff] }
  0x39   :  { %410 = vmatpush.msrb.mxu3 %v409_v1  ;;  %329 = vmatpush.msrb.mxu2 %v1347_v7 }
  0x3a   :  { %515 = vmatpush.msra.mxu1 %v1322_v53  ;;  %475 = vmatpush.msra.mxu0 %v1345_v6  ;;  %v1550_v6 = vand.u32 4294901760, %v664_v63  ;;  %v755_v40 = vand.u32 4294901760, %v1608_v31 }
  0x3b   :  { %416 = vmatpush.msrb.mxu3 %v415_v30  ;;  %331 = vmatpush.msrb.mxu2 %v1353_v13 }
  0x3c   :  { %517 = vmatpush.msra.mxu1 %v1324_v54  ;;  %478 = vmatpush.msra.mxu0 %v1359_v15 }
  0x3d   :  { %422 = vmatpush.msrb.mxu3 %v421_v34  ;;  %333 = vmatpush.msrb.mxu2 %v1393_v38  ;;  %v1613_v34 = vand.u32 4294901760, %v658_v17 }
  0x3e   :  { %519 = vmatpush.msra.mxu1 %v1326_v58  ;;  %481 = vmatpush.msra.mxu0 %v1376_v25  ;;  %v1567_v25 = vsub.f32 %v664_v63, %v1550_v6 }
  0x3f   :  { %428 = vmatpush.msrb.mxu3 %v427_v3  ;;  %335 = vmatpush.msrb.mxu2 %v1395_v39  ;;  %v1624_v45 = vsub.f32 %v658_v17, %v1613_v34 }
  0x40   :  { %521 = vmatpush.msra.mxu1 %v1328_v59  ;;  %484 = vmatpush.msra.mxu0 %v1380_v33 }
  0x41   :  { %434 = vmatpush.msrb.mxu3 %v433_v41  ;;  %337 = vmatpush.msrb.mxu2 %v1399_v43 }
  0x42   :  { %523 = vmatpush.msra.mxu1 %v1339_v0  ;;  %487 = vmatpush.msra.mxu0 %v1404_v44  ;;  %v731_v44 = vand.u32 4294901760, %v1567_v25 }
  0x43   :  { %440 = vmatpush.msrb.mxu3 %v439_v46  ;;  %339 = vmatpush.msrb.mxu2 %v1414_v5 }
  0x44   :  { %525 = vmatpush.msra.mxu1 %v1347_v7  ;;  %490 = vmatpush.msra.mxu0 %v1412_v48  ;;  %v732_v1 = vsub.f32 %v1567_v25, %v731_v44 }
  0x45   :  { %446 = vmatpush.msrb.mxu3 %v445_v47  ;;  %341 = vmatpush.msrb.mxu2 %v1426_v56 }
  0x46   :  { %527 = vmatpush.msra.mxu1 %v1353_v13  ;;  %493 = vmatpush.msra.mxu0 %v1424_v55  ;;  %v733_v3 = vand.u32 4294901760, %v732_v1 }
  0x47   :  { %615 = vmatpush.msra.mxu3 %v1259_v11  ;;  %548 = vmatpush.msra.mxu2 %v353_v27  ;;  %v1039_v11 = vld [vmem:[#allocation10] ss:$0 sm:$0xff] }
  0x48   :  { %529 = vmatpush.msra.mxu1 %v1393_v38  ;;  %496 = vmatpush.msra.mxu0 %v1435_v60 }
  0x49   :  { %617 = vmatpush.msra.mxu3 %v1278_v20  ;;  %552 = vmatpush.msra.mxu2 %v359_v36 }
  0x4a   :  { %531 = vmatpush.msra.mxu1 %v1395_v39  ;;  %499 = vmatpush.msra.mxu0 %v1445_v24 }
  0x4b   :  { %619 = vmatpush.msra.mxu3 %v1280_v21  ;;  %556 = vmatpush.msra.mxu2 %v365_v37 }
  0x4c   :  { %533 = vmatpush.msra.mxu1 %v1399_v43 }
  0x4d   :  { %621 = vmatpush.msra.mxu3 %v1320_v52  ;;  %560 = vmatpush.msra.mxu2 %v371_v8  ;;  %v667_v52 = vld [vmem:[#allocation8 + $0x78] sm:$0xff]  ;;  %v1554_v8 = vand.u32 4294901760, %v662_v2 }
  0x4e   :  { %535 = vmatpush.msra.mxu1 %v1414_v5 }
  0x4f   :  { %623 = vmatpush.msra.mxu3 %v1322_v53  ;;  %564 = vmatpush.msra.mxu2 %v377_v10  ;;  %v666_v53 = vld [vmem:[#allocation8 + $0x70] sm:$0xff]  ;;  %v661_v10 = vld [vmem:[#allocation8 + $0x48] sm:$0xff] }
  0x50   :  { %537 = vmatpush.msra.mxu1 %v1426_v56  ;;  %v1546_v61 = vand.u32 4294901760, %v666_v53 }
  0x51   :  { %625 = vmatpush.msra.mxu3 %v1324_v54  ;;  %568 = vmatpush.msra.mxu2 %v383_v12  ;;  %v665_v54 = vld [vmem:[#allocation8 + $0x68] sm:$0xff] }
  0x52   :  { %v1548_v62 = vand.u32 4294901760, %v665_v54 }
  0x53   :  { %627 = vmatpush.msra.mxu3 %v1326_v58  ;;  %572 = vmatpush.msra.mxu2 %v389_v14  ;;  %v1560_v14 = vsub.f32 %v666_v53, %v1546_v61 }
  0x54   :  { %v1563_v15 = vsub.f32 %v665_v54, %v1548_v62 }
  0x55   :  { %629 = vmatpush.msra.mxu3 %v1328_v59  ;;  %576 = vmatpush.msra.mxu2 %v395_v16  ;;  %v1544_v59 = vand.u32 4294901760, %v667_v52 }
  0x57   :  { %631 = vmatpush.msra.mxu3 %v1339_v0  ;;  %580 = vmatpush.msra.mxu2 %v401_v26  ;;  %v663_v0 = vld [vmem:[#allocation8 + $0x58] sm:$0xff]  ;;  %v1573_v26 = vsub.f32 %v662_v2, %v1554_v8  ;;  %v657_v2 = vld [vmem:[#allocation8 + $0x28] sm:$0xff] }
  0x58   :  { %671 = vmatpush.msrb.mxu0 %v1544_v59 }
  0x59   :  { %633 = vmatpush.msra.mxu3 %v1347_v7  ;;  %584 = vmatpush.msra.mxu2 %v407_v42  ;;  %v1552_v7 = vand.u32 4294901760, %v663_v0 }
  0x5a   :  { %673 = vmatpush.msrb.mxu0 %v1546_v61 }
  0x5b   :  { %635 = vmatpush.msra.mxu3 %v1353_v13  ;;  %588 = vmatpush.msra.mxu2 %v413_v4  ;;  %v1557_v13 = vsub.f32 %v667_v52, %v1544_v59  ;;  %v1570_v33 = vsub.f32 %v663_v0, %v1552_v7  ;;  %v725_v4 = vand.u32 4294901760, %v1563_v15 }
  0x5c   :  { %675 = vmatpush.msrb.mxu0 %v1548_v62 }
  0x5d   :  { %637 = vmatpush.msra.mxu3 %v1393_v38  ;;  %592 = vmatpush.msra.mxu2 %v419_v51  ;;  %v1575_v38 = vand.u32 4294901760, %v661_v10  ;;  %v713_v42 = vand.u32 4294901760, %v1557_v13  ;;  %v737_v48 = vand.u32 4294901760, %v1570_v33  ;;  %v726_v55 = vsub.f32 %v1563_v15, %v725_v4 }
  0x5e   :  { %677 = vmatpush.msrb.mxu0 %v1550_v6 }
  0x5f   :  { %639 = vmatpush.msra.mxu3 %v1395_v39  ;;  %596 = vmatpush.msra.mxu2 %v425_v57  ;;  %v714_v50 = vsub.f32 %v1557_v13, %v713_v42  ;;  %v727_v30 = vand.u32 4294901760, %v726_v55  ;;  %v1677_v55 = vand.u32 4294901760, %v655_v49 }
  0x60   :  { %679 = vmatpush.msrb.mxu0 %v1552_v7 }
  0x61   :  { %641 = vmatpush.msra.mxu3 %v1399_v43  ;;  %600 = vmatpush.msra.mxu2 %v431_v23  ;;  %v719_v43 = vand.u32 4294901760, %v1560_v14  ;;  %v715_v57 = vand.u32 4294901760, %v714_v50  ;;  %v738_v23 = vsub.f32 %v1570_v33, %v737_v48 }
  0x62   :  { %681 = vmatpush.msrb.mxu0 %v1554_v8 }
  0x63   :  { %643 = vmatpush.msra.mxu3 %v1414_v5  ;;  %604 = vmatpush.msra.mxu2 %v437_v32  ;;  %v1584_v5 = vsub.f32 %v661_v10, %v1575_v38  ;;  %v720_v51 = vsub.f32 %v1560_v14, %v719_v43  ;;  %v1611_v32 = vand.u32 4294901760, %v659_v9  ;;  %v739_v47 = vand.u32 4294901760, %v738_v23  ;;  %v653_v23 = vld [vmem:[#allocation8 + $0x8] sm:$0xff] }
  0x64   :  { %716 = vmatpush.msrb.mxu1 %v715_v57  ;;  %683 = vmatpush.msrb.mxu0 %v1575_v38  ;;  %v1664_v10 = vand.u32 4294901760, %v657_v2 }
  0x65   :  { %645 = vmatpush.msra.mxu3 %v1426_v56  ;;  %608 = vmatpush.msra.mxu2 %v443_v18  ;;  %v743_v56 = vand.u32 4294901760, %v1573_v26  ;;  %v721_v60 = vand.u32 4294901760, %v720_v51  ;;  %v749_v24 = vand.u32 4294901760, %v1584_v5  ;;  %v1620_v41 = vsub.f32 %v659_v9, %v1611_v32  ;;  %v654_v9 = vld [vmem:[#allocation8 + $0x10] sm:$0xff] }
  0x66   :  { %685 = vmatpush.msrb.mxu0 %v1601_v22  ;;  %v1689_v1 = vand.u32 4294901760, %v654_v9 }
  0x67   :  { %v744_v35 = vsub.f32 %v1573_v26, %v743_v56  ;;  %722 = vmatpush.msrb.mxu1 %v721_v60  ;;  %v1687_v60 = vsub.f32 %v655_v49, %v1677_v55 }
  0x68   :  { %687 = vmatpush.msrb.mxu0 %v1611_v32 }
  0x69   :  { %728 = vmatpush.msrb.mxu1 %v727_v30 }
  0x6a   :  { %689 = vmatpush.msrb.mxu0 %v1613_v34 }
  0x6b   :  { %734 = vmatpush.msrb.mxu1 %v733_v3  ;;  %v790_v3 = vsub.f32 %v654_v9, %v1689_v1 }
  0x6c   :  { %691 = vmatpush.msrb.mxu0 %v1664_v10 }
  0x6d   :  { %740 = vmatpush.msrb.mxu1 %v739_v47  ;;  %v652_v47 = vld [vmem:[#allocation8] sm:$0xff] }
  0xa1   :  { %v132_v19 = vpop.f32.mrf.mxu0 }
  0xa2   :  { %v133_v20 = vadd.f32 %v1039_v11, %v132_v19  ;;  %v750_v11 = vsub.f32 %v1584_v5, %v749_v24  ;;  %v761_v19 = vand.u32 4294901760, %v1620_v41 }
  0xa5   :  { %v173_v21 = vpop.f32.mrf.mxu1  ;;  %v230_v29 = vpop.f32.mrf.mxu3 }
  0xa6   :  { %v203_v27 = vpop.f32.mrf.mxu2  ;;  %v174_v28 = vadd.f32 %v173_v21, %v133_v20  ;;  %v745_v21 = vand.u32 4294901760, %v744_v35 }
  0xa8   :  { %v204_v36 = vadd.f32 %v203_v27, %v174_v28  ;;  %v756_v27 = vsub.f32 %v1608_v31, %v755_v40  ;;  %v767_v28 = vand.u32 4294901760, %v1624_v45  ;;  %746 = vmatpush.msrb.mxu1 %v745_v21  ;;  %v791_v21 = vand.u32 4294901760, %v790_v3 }
  0xa9   :  { %v263_v37 = vpop.f32.mrf.mxu0 }
  0xaa   :  { %v231_v58 = vadd.f32 %v230_v29, %v204_v36  ;;  %v751_v36 = vand.u32 4294901760, %v750_v11  ;;  %v757_v53 = vand.u32 4294901760, %v756_v27  ;;  %v768_v54 = vsub.f32 %v1624_v45, %v767_v28 }
  0xab   :  { %v700_v27 = vand.u32 4294901760, %v652_v47 }
  0xac   :  { %v264_v12 = vadd.f32 %v263_v37, %v231_v58  ;;  %v762_v37 = vsub.f32 %v1620_v41, %v761_v19  ;;  %752 = vmatpush.msrb.mxu1 %v751_v36  ;;  %v769_v0 = vand.u32 4294901760, %v768_v54 }
  0xad   :  { %v288_v16 = vpop.f32.mrf.mxu1 }
  0xae   :  { %v289_v39 = vadd.f32 %v288_v16, %v264_v12  ;;  %v763_v63 = vand.u32 4294901760, %v762_v37  ;;  %758 = vmatpush.msrb.mxu1 %v757_v53  ;;  %v656_v12 = vld [vmem:[#allocation8 + $0x20] sm:$0xff]  ;;  %v1667_v16 = vsub.f32 %v657_v2, %v1664_v10  ;;  %v792_v37 = vsub.f32 %v790_v3, %v791_v21 }
  0xb0   :  { %1042 = vtanh.f32 %v289_v39  ;;  %764 = vmatpush.msrb.mxu1 %v763_v63  ;;  %v1669_v39 = vand.u32 4294901760, %v656_v12  ;;  %v773_v50 = vand.u32 4294901760, %v1667_v16  ;;  %v793_v54 = vand.u32 4294901760, %v792_v37 }
  0xb2   :  { %770 = vmatpush.msrb.mxu1 %v769_v0  ;;  %v1675_v51 = vsub.f32 %v656_v12, %v1669_v39  ;;  %693 = vmatpush.msrb.mxu0 %v1669_v39  ;;  %v774_v17 = vsub.f32 %v1667_v16, %v773_v50 }
  0xb4   :  { %v779_v57 = vand.u32 4294901760, %v1675_v51  ;;  %695 = vmatpush.msrb.mxu0 %v1677_v55  ;;  %v775_v30 = vand.u32 4294901760, %v774_v17 }
  0xb6   :  { %v1043_v18 = vpop.eup %1042  ;;  %v780_v35 = vsub.f32 %v1675_v51, %v779_v57  ;;  %697 = vmatpush.msrb.mxu0 %v1689_v1  ;;  %776 = vmatpush.msrb.mxu1 %v775_v30 }
  0xb7   :  { %v342_v46 = vand.u32 4294901760, %v1043_v18 }
  0xb8   :  { %v781_v11 = vand.u32 4294901760, %v780_v35 }
  0xb9   :  { %448 = vmatmul.f32.vlgmr.msrb.gmra.mxu3 %v342_v46  ;;  %v343_v20 = vsub.f32 %v1043_v18, %v342_v46  ;;  %v785_v18 = vand.u32 4294901760, %v1687_v60 }
  0xba   :  { %867 = vmatpush.msrb.mxu3 %v1544_v59  ;;  %782 = vmatpush.msrb.mxu1 %v781_v11 }
  0xbb   :  { %502 = vmatmul.f32.vlgmr.msra.gmra.mxu0 %v343_v20  ;;  %v344_v29 = vand.u32 4294901760, %v343_v20 }
  0xbc   :  { %869 = vmatpush.msrb.mxu3 %v1546_v61 }
  0xbd   :  { %541 = vmatmul.f32.vlgmr.msra.gmra.mxu1 %v344_v29  ;;  %v345_v52 = vsub.f32 %v343_v20, %v344_v29  ;;  %v786_v20 = vsub.f32 %v1687_v60, %v785_v18 }
  0xbe   :  { %871 = vmatpush.msrb.mxu3 %v1548_v62 }
  0xbf   :  { %v346_v58 = vand.u32 4294901760, %v345_v52  ;;  %v787_v36 = vand.u32 4294901760, %v786_v20  ;;  %v802_v52 = vsub.f32 %v652_v47, %v700_v27 }
  0xc0   :  { %873 = vmatpush.msrb.mxu3 %v1550_v6 }
  0xc1   :  { %347 = vmatmul.f32.vlgmr.msrb.gmra.mxu2 %v346_v58  ;;  %647 = vmatmul.f32.vlgmr.msra.gmra.mxu3 %v342_v46  ;;  %v803_v58 = vand.u32 4294901760, %v802_v52 }
  0xc2   :  { %814 = vmatpush.msrb.mxu2 %v1557_v13  ;;  %875 = vmatpush.msrb.mxu3 %v1552_v7 }
  0xc3   :  { %788 = vmatpush.msrb.mxu1 %v787_v36  ;;  %v804_v0 = vsub.f32 %v802_v52, %v803_v58 }
  0xc4   :  { %817 = vmatpush.msrb.mxu2 %v1560_v14  ;;  %877 = vmatpush.msrb.mxu3 %v1554_v8 }
  0xc5   :  { %794 = vmatpush.msrb.mxu1 %v793_v54  ;;  %v805_v12 = vand.u32 4294901760, %v804_v0 }
  0xc6   :  { %820 = vmatpush.msrb.mxu2 %v1563_v15  ;;  %879 = vmatpush.msrb.mxu3 %v1575_v38 }
  0xc8   :  { %823 = vmatpush.msrb.mxu2 %v1567_v25  ;;  %881 = vmatpush.msrb.mxu3 %v1601_v22 }
  0xc9   :  { %610 = vmatmul.f32.vlgmr.msra.gmra.mxu2 %v342_v46  ;;  %v698_v46 = vand.u32 4294901760, %v653_v23 }
  0xca   :  { %826 = vmatpush.msrb.mxu2 %v1570_v33  ;;  %883 = vmatpush.msrb.mxu3 %v1611_v32 }
  0xcb   :  { %v796_v29 = vsub.f32 %v653_v23, %v698_v46  ;;  %699 = vmatpush.msrb.mxu0 %v698_v46 }
  0xcc   :  { %829 = vmatpush.msrb.mxu2 %v1573_v26  ;;  %885 = vmatpush.msrb.mxu3 %v1613_v34 }
  0xcd   :  { %v797_v53 = vand.u32 4294901760, %v796_v29  ;;  %701 = vmatpush.msrb.mxu0 %v700_v27 }
  0xce   :  { %832 = vmatpush.msrb.mxu2 %v1584_v5  ;;  %887 = vmatpush.msrb.mxu3 %v1664_v10 }
  0xcf   :  { %908 = vmatpush.msra.mxu0 %v713_v42  ;;  %v798_v63 = vsub.f32 %v796_v29, %v797_v53 }
  0xd0   :  { %835 = vmatpush.msrb.mxu2 %v1608_v31  ;;  %889 = vmatpush.msrb.mxu3 %v1669_v39 }
  0xd1   :  { %912 = vmatpush.msra.mxu0 %v719_v43  ;;  %v799_v2 = vand.u32 4294901760, %v798_v63 }
  0xd2   :  { %838 = vmatpush.msrb.mxu2 %v1620_v41  ;;  %891 = vmatpush.msrb.mxu3 %v1677_v55 }
  0xd3   :  { %916 = vmatpush.msra.mxu0 %v725_v4  ;;  %800 = vmatpush.msrb.mxu1 %v799_v2 }
  0xd4   :  { %841 = vmatpush.msrb.mxu2 %v1624_v45  ;;  %893 = vmatpush.msrb.mxu3 %v1689_v1 }
  0xd5   :  { %920 = vmatpush.msra.mxu0 %v731_v44  ;;  %806 = vmatpush.msrb.mxu1 %v805_v12 }
  0xd6   :  { %844 = vmatpush.msrb.mxu2 %v1667_v16  ;;  %895 = vmatpush.msrb.mxu3 %v698_v46 }
  0xd7   :  { %975 = vmatpush.msra.mxu1 %v1544_v59  ;;  %924 = vmatpush.msra.mxu0 %v737_v48  ;;  %v1040_v59 = vld [vmem:[#allocation10 + $0x1] ss:$0 sm:$0xff] }
  0xd8   :  { %847 = vmatpush.msrb.mxu2 %v1675_v51  ;;  %897 = vmatpush.msrb.mxu3 %v700_v27 }
  0xd9   :  { %977 = vmatpush.msra.mxu1 %v1546_v61  ;;  %928 = vmatpush.msra.mxu0 %v743_v56  ;;  %v1041_v56 = vld [vmem:[#allocation10 + $0x2] ss:$0 sm:$0xff] }
  0xda   :  { %850 = vmatpush.msrb.mxu2 %v1687_v60 }
  0xdb   :  { %979 = vmatpush.msra.mxu1 %v1548_v62  ;;  %932 = vmatpush.msra.mxu0 %v749_v24 }
  0xdc   :  { %853 = vmatpush.msrb.mxu2 %v790_v3 }
  0xdd   :  { %981 = vmatpush.msra.mxu1 %v1550_v6  ;;  %936 = vmatpush.msra.mxu0 %v755_v40 }
  0xde   :  { %856 = vmatpush.msrb.mxu2 %v796_v29 }
  0xdf   :  { %983 = vmatpush.msra.mxu1 %v1552_v7  ;;  %940 = vmatpush.msra.mxu0 %v761_v19 }
  0xe0   :  { %859 = vmatpush.msrb.mxu2 %v802_v52 }
  0xe1   :  { %985 = vmatpush.msra.mxu1 %v1554_v8  ;;  %944 = vmatpush.msra.mxu0 %v767_v28 }
  0xe3   :  { %987 = vmatpush.msra.mxu1 %v1575_v38  ;;  %948 = vmatpush.msra.mxu0 %v773_v50 }
  0xe5   :  { %989 = vmatpush.msra.mxu1 %v1601_v22  ;;  %952 = vmatpush.msra.mxu0 %v779_v57 }
  0xe7   :  { %991 = vmatpush.msra.mxu1 %v1611_v32  ;;  %956 = vmatpush.msra.mxu0 %v785_v18 }
  0xe9   :  { %993 = vmatpush.msra.mxu1 %v1613_v34  ;;  %960 = vmatpush.msra.mxu0 %v791_v21 }
  0xeb   :  { %995 = vmatpush.msra.mxu1 %v1664_v10  ;;  %964 = vmatpush.msra.mxu0 %v797_v53 }
  0xed   :  { %997 = vmatpush.msra.mxu1 %v1669_v39  ;;  %968 = vmatpush.msra.mxu0 %v803_v58 }
  0xef   :  { %999 = vmatpush.msra.mxu1 %v1677_v55 }
  0xf1   :  { %1001 = vmatpush.msra.mxu1 %v1689_v1 }
  0xf3   :  { %1003 = vmatpush.msra.mxu1 %v698_v46 }
  0xf5   :  { %1005 = vmatpush.msra.mxu1 %v700_v27 }
 0x138   :  { %v503_v8 = vpop.f32.mrf.mxu0 }
 0x13a   :  { %v542_v14 = vpop.f32.mrf.mxu1 }
 0x13c   :  { %v449_v61 = vpop.f32.mrf.mxu3 }
 0x144   :  { %v348_v62 = vpop.f32.mrf.mxu2  ;;  %v648_v26 = vpop.f32.mrf.mxu3 }
 0x145   :  { %v349_v6 = vadd.f32 %v1040_v59, %v348_v62 }
 0x147   :  { %v450_v7 = vadd.f32 %v449_v61, %v349_v6 }
 0x149   :  { %v504_v13 = vadd.f32 %v503_v8, %v450_v7 }
 0x14b   :  { %v543_v15 = vadd.f32 %v542_v14, %v504_v13 }
 0x14c   :  { %v611_v25 = vpop.f32.mrf.mxu2 }
 0x14d   :  { %v612_v33 = vadd.f32 %v611_v25, %v543_v15 }
 0x14f   :  { %v649_v38 = vadd.f32 %v648_v26, %v612_v33 }
 0x151   :  { %1044 = vtanh.f32 %v649_v38 }
 0x157   :  { %v1045_v42 = vpop.eup %1044 }
 0x158   :  { %v702_v43 = vand.u32 4294901760, %v1045_v42 }
 0x15a   :  { %808 = vmatmul.f32.vlgmr.msrb.gmra.mxu1 %v702_v43  ;;  %v703_v4 = vsub.f32 %v1045_v42, %v702_v43 }
 0x15c   :  { %862 = vmatmul.f32.vlgmr.msrb.gmra.mxu2 %v703_v4  ;;  %v704_v44 = vand.u32 4294901760, %v703_v4 }
 0x15e   :  { %901 = vmatmul.f32.vlgmr.msrb.gmra.mxu3 %v704_v44  ;;  %v705_v48 = vsub.f32 %v703_v4, %v704_v44 }
 0x160   :  { %v706_v5 = vand.u32 4294901760, %v705_v48 }
 0x162   :  { %707 = vmatmul.f32.vlgmr.msrb.gmra.mxu0 %v706_v5  ;;  %1007 = vmatmul.f32.vlgmr.msra.gmra.mxu1 %v702_v43 }
 0x16a   :  { %970 = vmatmul.f32.vlgmr.msra.gmra.mxu0 %v702_v43 }
 0x1d7   :  { %v809_v22 = vpop.f32.mrf.mxu1 }
 0x1df   :  { %v708_v24 = vpop.f32.mrf.mxu0  ;;  %v863_v34 = vpop.f32.mrf.mxu2 }
 0x1e0   :  { %v709_v31 = vadd.f32 %v1041_v56, %v708_v24  ;;  %v1008_v10 = vpop.f32.mrf.mxu1 }
 0x1e1   :  { %v902_v41 = vpop.f32.mrf.mxu3 }
 0x1e2   :  { %v810_v32 = vadd.f32 %v809_v22, %v709_v31 }
 0x1e4   :  { %v864_v40 = vadd.f32 %v863_v34, %v810_v32 }
 0x1e6   :  { %v903_v45 = vadd.f32 %v902_v41, %v864_v40 }
 0x1e7   :  { %v971_v19 = vpop.f32.mrf.mxu0 }
 0x1e8   :  { %v972_v28 = vadd.f32 %v971_v19, %v903_v45 }
 0x1ea   :  { %v1009_v16 = vadd.f32 %v1008_v10, %v972_v28 }
 0x1ec   :  { %1011 = vst [vmem:[#allocation11] sm:$0xff] %v1009_v16 }
 0x1ed   :  { %1022 = dma.vmem_to_hbm [thread:$0]  %s1018_s4, 128, %s1020_s19, [#allocation4]  }
 0x1ee   :  { %1196 = dma.done.wait [#allocation4], 128  }
 0x1ef   :  { %1197 = vsyncadd [#allocation4], 4294967168 }
 0x1f0   :  { %1027 = vsyncpa [#allocation3], 1 }
 0x1f1   :  { %1028 = vsyncpa [#allocation6], 1 }
 0x1f2   :  { %1029 = vsyncpa [#allocation9], 1 }
 0x1f3   :  { %1030 = vsyncpa [#allocation4], 1 }

</bundles_post_ra>
